<compile_context>
chip_gen: v5e
topology: v5e:2x2
jax: 0.10.0
libtpu: 0.0.40
codegen_flags: <defaults>
</compile_context>

<pallas_src>
import numpy as np
import jax
import jax.numpy as jnp
from jax.experimental import pallas as pl
from jax.experimental.pallas import tpu as pltpu


def make_schedule(steps=40, beta_type="linear"):
    """Replicates noise_scheduler.__init__ buffer construction (linear/cos/sigmoid)."""
    if beta_type == "linear":
        beta = 1 - 1 / (steps - np.arange(1, steps + 1) + 1)
        k_final = [1.0]
        b_final = [0.0]
        for i in range(steps):
            k_final.append(k_final[-1] * beta[i])
            b_final.append(beta[i] * b_final[-1] + 0.5 * (1 - beta[i]))
        k_final = np.array(k_final[1:])
        b_final = np.array(b_final[1:])
    elif beta_type == "cos":
        k_final = np.linspace(0.0, 1.0, steps + 1)
        k_final = 0.5 + 0.5 * np.cos(k_final * np.pi)
        b_final = (1 - k_final) * 0.5
        beta = np.array([k_final[i + 1] / k_final[i] for i in range(steps)])
        k_final = k_final[1:]
        b_final = b_final[1:]
    elif beta_type == "sigmoid":
        def sigmoid(x):
            return 1 / (1 + np.exp(-x))

        def sigmoid_schedule(t, start=-3, end=3, tau=1.0, clip_min=0.0):
            v_start = sigmoid(start / tau)
            v_end = sigmoid(end / tau)
            output = sigmoid((t * (end - start) + start) / tau)
            output = (v_end - output) / (v_end - v_start)
            return np.clip(output, clip_min, 1.0)

        k_final = np.linspace(0.0, 1.0, steps + 1)
        k_final = sigmoid_schedule(k_final, 0, 3, 0.8)
        b_final = (1 - k_final) * 0.5
        beta = np.array([k_final[i + 1] / k_final[i] for i in range(steps)])
        k_final = k_final[1:]
        b_final = b_final[1:]
    else:
        raise NotImplementedError

    k_final = np.hstack([1, k_final]).astype(np.float32)   # shape (steps+1,)
    b_final = np.hstack([0, b_final]).astype(np.float32)   # shape (steps+1,)
    beta_arr = np.hstack([1, beta]).astype(np.float32)
    cumbeta = np.cumprod(beta_arr).astype(np.float32)
    return k_final, b_final, beta_arr, cumbeta


def _affine_kernel(x_ref, k_ref, b_ref, o_ref):
    # x_ref: (TB, TF) VMEM tile; k_ref / b_ref: (TB, 1) f32 per-row scalars (lane broadcast).
    x = x_ref[...].astype(jnp.float32)
    o_ref[...] = (x * k_ref[...] + b_ref[...]).astype(o_ref.dtype)


def _round_down(x, unit):
    return (x // unit) * unit


def _round_up(x, unit):
    return ((x + unit - 1) // unit) * unit


def _default_tile_bytes():
    """~2 MiB on v5e (16 MiB scoped-VMEM default), ~4 MiB on v6e/v7x."""
    try:
        kind = jax.devices()[0].device_kind.lower()
    except Exception:
        kind = ""
    if "v5" in kind:
        return 2 * 1024 * 1024
    return 4 * 1024 * 1024


def noise_scheduler_forward(x, t, k_final, b_final, *,
                            target_tile_bytes=None,
                            donate_x=False):
    """out = k_final[t][:, None, ...] * x + b_final[t][:, None, ...]  (any x rank >= 1)."""
    if target_tile_bytes is None:
        target_tile_bytes = _default_tile_bytes()

    B = x.shape[0]
    orig_shape = x.shape
    x2 = x.reshape(B, -1)                      # (B, F) — no padding, no copies.
    F = x2.shape[1]
    itemsize = jnp.dtype(x2.dtype).itemsize

    # Hoist the tiny schedule gather out of the kernel (hot loop is a pure streaming FMA).
    t32 = t.astype(jnp.int32)
    kb = k_final[t32].astype(jnp.float32).reshape(B, 1)
    bb = b_final[t32].astype(jnp.float32).reshape(B, 1)

    # ---- Tile sizing -------------------------------------------------------
    # Lane (last-dim) tile: full row if it fits the byte budget, else the largest
    # multiple of 128 under the budget (cdiv grid + masked partial edge block).
    max_lanes = max(128, _round_down(target_tile_bytes // (8 * itemsize), 128))
    TF = F if F <= max_lanes else max_lanes
    # Sublane (batch) tile: full batch if it fits, else the largest multiple of 8.
    max_rows = max(8, _round_down(target_tile_bytes // (max(TF, 1) * itemsize), 8))
    TB = B if B <= max_rows else max_rows

    # v7x has two TensorCores: make sure a mid/large array doesn't collapse to a single
    # grid point (one TC idle, no pipelining).  Tiny arrays stay single-tile.
    if pl.cdiv(B, TB) * pl.cdiv(F, TF) < 2 and B * F * itemsize > 512 * 1024:
        if TF >= 256:
            TF = _round_up(pl.cdiv(TF, 2), 128)
        elif TB >= 16:
            TB = _round_up(pl.cdiv(TB, 2), 8)

    grid = (pl.cdiv(B, TB), pl.cdiv(F, TF))

    # Explicit scoped-VMEM budget: double-buffered input + output tiles plus headroom.
    tile_bytes = TB * TF * itemsize
    vmem_limit = int(min(max(6 * tile_bytes, 8 * 1024 * 1024), 30 * 1024 * 1024))

    cost = pl.CostEstimate(
        flops=2 * B * F,
        transcendentals=0,
        bytes_accessed=2 * B * F * itemsize + 2 * B * 4,
    )

    out = pl.pallas_call(
        _affine_kernel,
        out_shape=jax.ShapeDtypeStruct((B, F), x2.dtype),
        grid=grid,
        in_specs=[
            pl.BlockSpec((TB, TF), lambda i, j: (i, j)),   # x tile
            pl.BlockSpec((TB, 1), lambda i, j: (i, 0)),    # k per-row scalar
            pl.BlockSpec((TB, 1), lambda i, j: (i, 0)),    # b per-row scalar
        ],
        out_specs=pl.BlockSpec((TB, TF), lambda i, j: (i, j)),
        compiler_params=pltpu.CompilerParams(
            dimension_semantics=("parallel", "parallel"),
            vmem_limit_bytes=vmem_limit),
        cost_estimate=cost,
        input_output_aliases={0: 0} if donate_x else {},
    )(x2, kb, bb)

    return out.reshape(orig_shape)


if __name__ == "__main__":
    steps = 40
    k_final_np, b_final_np, beta_np, cumbeta_np = make_schedule(steps, "linear")
    k_final = jnp.asarray(k_final_np)
    b_final = jnp.asarray(b_final_np)

    key = jax.random.PRNGKey(0)
    kx, kt, kx2, kt2, kx3, kt3 = jax.random.split(key, 6)

    # Case 1: lane-aligned NCHW input (F = 4*16*16 = 1024, multiple of 128).
    B, C, H, W = 2, 4, 16, 16
    x = jax.random.uniform(kx, (B, C, H, W), dtype=jnp.float32)
    t = jax.random.randint(kt, (B,), 0, steps + 1, dtype=jnp.int32)
    out = jax.block_until_ready(noise_scheduler_forward(x, t, k_final, b_final))
    ref = k_final[t].reshape(B, 1, 1, 1) * x + b_final[t].reshape(B, 1, 1, 1)
    np.testing.assert_allclose(np.asarray(out), np.asarray(ref), rtol=1e-6, atol=1e-6)

    # Case 2: non-128-multiple feature size (F = 300) — full-extent lane block, no padding.
    B2, C2, H2, W2 = 2, 3, 10, 10
    x2 = jax.random.uniform(kx2, (B2, C2, H2, W2), dtype=jnp.float32)
    t2 = jax.random.randint(kt2, (B2,), 0, steps + 1, dtype=jnp.int32)
    out2 = jax.block_until_ready(noise_scheduler_forward(x2, t2, k_final, b_final))
    ref2 = k_final[t2].reshape(B2, 1, 1, 1) * x2 + b_final[t2].reshape(B2, 1, 1, 1)
    np.testing.assert_allclose(np.asarray(out2), np.asarray(ref2), rtol=1e-6, atol=1e-6)

    # Case 3: odd batch + unaligned features with a tiny tile budget to exercise the
    # masked partial-edge-block path on both grid axes (TB=8 vs B=10, TF=128 vs F=300).
    B3, C3, H3, W3 = 10, 3, 10, 10
    x3 = jax.random.uniform(kx3, (B3, C3, H3, W3), dtype=jnp.float32)
    t3 = jax.random.randint(kt3, (B3,), 0, steps + 1, dtype=jnp.int32)
    out3 = jax.block_until_ready(
        noise_scheduler_forward(x3, t3, k_final, b_final, target_tile_bytes=4096))
    ref3 = k_final[t3].reshape(B3, 1, 1, 1) * x3 + b_final[t3].reshape(B3, 1, 1, 1)
    np.testing.assert_allclose(np.asarray(out3), np.asarray(ref3), rtol=1e-6, atol=1e-6)

    print("KERNEL_OK")
</pallas_src>

<mosaic_0001>
module attributes {stable_mosaic.version = 11 : i64} {
  func.func @_affine_kernel(%arg0: i32, %arg1: i32, %arg2: memref<2x1024xf32, #tpu.memory_space<vmem>>, %arg3: memref<2x1xf32, #tpu.memory_space<vmem>>, %arg4: memref<2x1xf32, #tpu.memory_space<vmem>>, %arg5: memref<2x1024xf32, #tpu.memory_space<vmem>>) attributes {dimension_semantics = [#tpu.dimension_semantics<parallel>, #tpu.dimension_semantics<parallel>], iteration_bounds = array<i64: 1, 1>, scalar_prefetch = 0 : i64, scratch_operands = 0 : i64, tpu.core_type = #tpu.core_type<tc>, window_params = [{transform_indices = @transform_0, window_bounds = array<i64: 2, 1024>}, {transform_indices = @transform_1, window_bounds = array<i64: 2, 1>}, {transform_indices = @transform_2, window_bounds = array<i64: 2, 1>}, {transform_indices = @transform_3, window_bounds = array<i64: 2, 1024>}]} {
    %c0 = arith.constant 0 : index
    %c0_0 = arith.constant 0 : index
    %0 = vector.load %arg2[%c0, %c0_0] : memref<2x1024xf32, #tpu.memory_space<vmem>>, vector<2x1024xf32>
    %c0_1 = arith.constant 0 : index
    %c0_2 = arith.constant 0 : index
    %1 = vector.load %arg3[%c0_1, %c0_2] : memref<2x1xf32, #tpu.memory_space<vmem>>, vector<2x1xf32>
    %2 = vector.broadcast %1 : vector<2x1xf32> to vector<2x1024xf32>
    %3 = arith.mulf %0, %2 : vector<2x1024xf32>
    %c0_3 = arith.constant 0 : index
    %c0_4 = arith.constant 0 : index
    %4 = vector.load %arg4[%c0_3, %c0_4] : memref<2x1xf32, #tpu.memory_space<vmem>>, vector<2x1xf32>
    %5 = vector.broadcast %4 : vector<2x1xf32> to vector<2x1024xf32>
    %6 = arith.addf %3, %5 : vector<2x1024xf32>
    %c0_5 = arith.constant 0 : index
    %c0_6 = arith.constant 0 : index
    %7 = vector.load %arg5[%c0_5, %c0_6] : memref<2x1024xf32, #tpu.memory_space<vmem>>, vector<2x1024xf32>
    tpu.vector_store %arg5[%c0_5, %c0_6], %6 {strides = array<i32>} : memref<2x1024xf32, #tpu.memory_space<vmem>>, vector<2x1024xf32>,
    return
  }
  func.func @transform_0(%arg0: i32, %arg1: i32) -> (i32, i32) {
    %c0_i32 = arith.constant 0 : i32
    return %arg0, %arg1 : i32, i32
  }
  func.func @transform_1(%arg0: i32, %arg1: i32) -> (i32, i32) {
    %c0_i32 = arith.constant 0 : i32
    %c0_i32_0 = arith.constant 0 : i32
    return %arg0, %c0_i32 : i32, i32
  }
  func.func @transform_2(%arg0: i32, %arg1: i32) -> (i32, i32) {
    %c0_i32 = arith.constant 0 : i32
    %c0_i32_0 = arith.constant 0 : i32
    return %arg0, %c0_i32 : i32, i32
  }
  func.func @transform_3(%arg0: i32, %arg1: i32) -> (i32, i32) {
    %c0_i32 = arith.constant 0 : i32
    return %arg0, %arg1 : i32, i32
  }
}

</mosaic_0001>

<bundles_post_ra>
// kernel: tpu_custom_call.1
= control target key start
LH: loop header
LB: loop body
LE: loop exit
PB: predicated region body
PF: predicated region fallthrough
CT: control target
= control target key end

     0   :  { %8 = vsyncpa [#allocation3], 0  ;;  %s167_s0 = inlined_call_operand.hbm [shape: f32[2,1024], index: 0, kind: input, shape index: {}]   ;;  %s168_s1 = inlined_call_operand.vmem [shape: f32[2,1], index: 1, kind: input, shape index: {}]   ;;  %s169_s2 = inlined_call_operand.vmem [shape: f32[2,1], index: 2, kind: input, shape index: {}]   ;;  %s170_s3 = inlined_call_operand.hbm [shape: f32[2,1024], index: 3, kind: output, shape index: {}]  }
   0x1   :  { %9 = vsyncpa [#allocation4], 0  ;;  %s15_s14 = sshll.u32 %s167_s0, 4  ;;  %s131_s15 = smov [#allocation2]   ;;  %s16_s14 = int_to_ptr.hbm [resolvable:$true] %s15_s14 }
   0x2   :  { %s17_s16 = sshll.u32 %s131_s15, 4  ;;  %s18_s16 = int_to_ptr.vmem [resolvable:$true] %s17_s16 }
   0x3   :  { %20 = dma.hbm_to_vmem [thread:$0]  %s16_s14, 256, %s18_s16, [#allocation3]  }
   0x4   :  { %127 = dma.done.wait [#allocation3], 256  }
   0x5   :  { %128 = vsyncadd [#allocation3], 4294967040  ;;  %v132_v0 = vmov 0   ;;  %v31_v1 = vld [vmem:[%s168_s1] sm:$0x3]  ;;  %v30_v9 = vld [vmem:[#allocation2 + $0x8] sm:$0xff] }
   0x6   :  { %78 = vset.pattern.permute.xlu0 %v132_v0  ;;  %v43_v2 = vld [vmem:[%s169_s2] sm:$0x3]  ;;  %v133_v3 = vmov 269488144   ;;  %s134_s0 = smov [#allocation5]   ;;  %s64_s23 = sshll.u32 %s170_s3, 4  ;;  %s65_s23 = int_to_ptr.hbm [resolvable:$true] %s64_s23 }
   0x7   :  { %34 = vperm.xlu0 %78, %v31_v1   ;;  %v37_v4 = vunpack.c.l.s4 %v133_v3  ;;  %v29_v8 = vld [vmem:[#allocation2] sm:$0xff]  ;;  %s62_s21 = sshll.u32 %s134_s0, 4  ;;  %s63_s21 = int_to_ptr.vmem [resolvable:$true] %s62_s21 }
   0x9   :  { %v38_v6 = vunpack.c.0.s8 %v37_v4 }
   0xf   :  { %46 = vperm.xlu0 %78, %v43_v2  }
  0x79   :  { %v35_v5 = vpop.permute.xlu0 %34 }
  0x7a   :  { %v39_v7 = vperm.slane %v35_v5, %v38_v6 }
  0x7c   :  { %v41_v11 = vmul.f32 %v39_v7, %v29_v8  ;;  %v42_v12 = vmul.f32 %v39_v7, %v30_v9 }
  0x81   :  { %v47_v10 = vpop.permute.xlu0 %46 }
  0x82   :  { %v51_v13 = vperm.slane %v47_v10, %v38_v6 }
  0x84   :  { %v53_v14 = vadd.f32 %v51_v13, %v41_v11  ;;  %v54_v15 = vadd.f32 %v51_v13, %v42_v12 }
  0x86   :  { %55 = vst [vmem:[#allocation5] sm:$0xff] %v53_v14 }
  0x87   :  { %56 = vst [vmem:[#allocation5 + $0x8] sm:$0xff] %v54_v15 }
  0x88   :  { %67 = dma.vmem_to_hbm [thread:$0]  %s63_s21, 256, %s65_s23, [#allocation4]  }
  0x89   :  { %129 = dma.done.wait [#allocation4], 256  }
  0x8a   :  { %130 = vsyncadd [#allocation4], 4294967040 }
  0x8b   :  { %72 = vsyncpa [#allocation3], 1 }
  0x8c   :  { %73 = vsyncpa [#allocation4], 1 }

</bundles_post_ra>
